<compile_context>
chip_gen: v6e
topology: v6e:2x2x1
jax: 0.10.0
libtpu: 0.0.40
codegen_flags: <defaults>
</compile_context>

<pallas_src>
import functools

import jax
import jax.numpy as jnp
from jax import lax
from jax.experimental import pallas as pl
from jax.experimental.pallas import tpu as pltpu


def _ce_tile_kernel(pred_ref, label_ref, loss_ref, *, n_total, tile_n):
    """Cross-entropy on one (TILE_N, C) batch tile.

    pred_ref : (TILE_N, C) logits in their native dtype (cast to f32 here)
    label_ref: (TILE_N, 1) int32 class indices
    loss_ref : (TILE_N, 1) f32 per-example loss (0 for padded rows)
    """
    i = pl.program_id(0)
    logits = pred_ref[...].astype(jnp.float32)                  # (TN, C)
    labels = label_ref[...]                                     # (TN, 1) i32
    tn, c = logits.shape

    # Numerically-stable softmax shift; `m` cancels between lse and target.
    m = jnp.max(logits, axis=-1, keepdims=True)                 # (TN, 1)
    shifted = logits - m                                        # (TN, C)
    lse_shifted = jnp.log(jnp.sum(jnp.exp(shifted), axis=-1, keepdims=True))

    # Gather the target logit via a one-hot mask built from a lane iota.
    col = lax.broadcasted_iota(jnp.int32, (tn, c), 1)           # (TN, C)
    onehot = (col == labels).astype(jnp.float32)                # (TN, C)
    target_shifted = jnp.sum(shifted * onehot, axis=-1, keepdims=True)

    per_example = lse_shifted - target_shifted                  # (TN, 1)

    # Mask rows that belong to batch padding (row id >= true N).
    row = lax.broadcasted_iota(jnp.int32, (tn, 1), 0) + i * tile_n
    valid = (row < n_total).astype(jnp.float32)
    loss_ref[...] = per_example * valid


def _pick_tile_n(n, c):
    """Pick a batch-tile size: <=~2 MiB of f32 logits per block, multiple of 8."""
    target_rows = max(8, (2 * 1024 * 1024) // max(c * 4, 1))
    target_rows = max(8, min((target_rows // 8) * 8, 1024))
    n_up = ((n + 7) // 8) * 8
    return min(target_rows, n_up)


def criterion_forward(pred, label, *, tile_n=None):
    """Pallas equivalent of Criterion.forward: returns [ce_loss(pred, label)]."""
    n, c = pred.shape
    label2d = label.reshape(n, 1).astype(jnp.int32)

    if tile_n is None:
        tile_n = _pick_tile_n(n, c)
    tile_n = max(8, ((int(tile_n) + 7) // 8) * 8)      # multiple of 8 sublanes

    num_tiles = pl.cdiv(n, tile_n)
    n_pad = num_tiles * tile_n

    # Pad the batch dim to a whole number of tiles; padded rows are masked
    # inside the kernel so they contribute exactly 0 to the loss sum.
    pred_pad = jnp.pad(pred, ((0, n_pad - n), (0, 0)))
    label_pad = jnp.pad(label2d, ((0, n_pad - n), (0, 0)))

    per_example = pl.pallas_call(
        functools.partial(_ce_tile_kernel, n_total=n, tile_n=tile_n),
        out_shape=jax.ShapeDtypeStruct((n_pad, 1), jnp.float32),
        grid=(num_tiles,),
        in_specs=[
            pl.BlockSpec((tile_n, c), lambda i: (i, 0)),   # logits (native dtype)
            pl.BlockSpec((tile_n, 1), lambda i: (i, 0)),   # labels
        ],
        out_specs=pl.BlockSpec((tile_n, 1), lambda i: (i, 0)),
        compiler_params=pltpu.CompilerParams(
            # Each tile is independent -> parallel axis (2 TCs on v7x).
            dimension_semantics=("parallel",),
        ),
    )(pred_pad, label_pad)

    loss = jnp.sum(per_example) / jnp.float32(n)   # divide by true N, not n_pad
    # Criterion.forward returns a list with the single loss term.
    return [loss]


if __name__ == "__main__":
    key = jax.random.PRNGKey(0)
    k_pred, k_lab = jax.random.split(key)

    # Small shapes consistent with a (batch, num_classes) CE input; N is chosen
    # NOT divisible by the tile size to exercise the ragged-tile masking path.
    N, C = 37, 128
    pred = jax.random.normal(k_pred, (N, C), dtype=jnp.float32)
    label = jax.random.randint(k_lab, (N,), 0, C, dtype=jnp.int32)

    # Pure-JAX reference (same math as nn.CrossEntropyLoss with mean reduction).
    ref = jnp.mean(jax.nn.logsumexp(pred, axis=-1) - pred[jnp.arange(N), label])

    # 1) multi-tile grid (3 tiles of 16 rows, last tile ragged/padded)
    out = criterion_forward(pred, label, tile_n=16)
    loss_tiled = jax.block_until_ready(out[0])
    assert jnp.allclose(loss_tiled, ref, rtol=1e-5, atol=1e-5), (loss_tiled, ref)

    # 2) default tile selection (single tile)
    out = criterion_forward(pred, label)
    loss_auto = jax.block_until_ready(out[0])
    assert jnp.allclose(loss_auto, ref, rtol=1e-5, atol=1e-5), (loss_auto, ref)

    # 3) bf16 logits path: no wrapper cast, cast happens inside the kernel
    pred_bf16 = pred.astype(jnp.bfloat16)
    ref_bf16 = jnp.mean(
        jax.nn.logsumexp(pred_bf16.astype(jnp.float32), axis=-1)
        - pred_bf16.astype(jnp.float32)[jnp.arange(N), label]
    )
    out = criterion_forward(pred_bf16, label, tile_n=16)
    loss_bf16 = jax.block_until_ready(out[0])
    assert jnp.allclose(loss_bf16, ref_bf16, rtol=1e-3, atol=1e-3), (loss_bf16, ref_bf16)

    print("KERNEL_OK")
</pallas_src>

<mosaic_0001>
module attributes {stable_mosaic.version = 11 : i64} {
  func.func @_ce_tile_kernel(%arg0: i32, %arg1: memref<16x128xf32, #tpu.memory_space<vmem>>, %arg2: memref<16x1xi32, #tpu.memory_space<vmem>>, %arg3: memref<16x1xf32, #tpu.memory_space<vmem>>) attributes {dimension_semantics = [#tpu.dimension_semantics<parallel>], iteration_bounds = array<i64: 3>, scalar_prefetch = 0 : i64, scratch_operands = 0 : i64, tpu.core_type = #tpu.core_type<tc>, window_params = [{transform_indices = @transform_0, window_bounds = array<i64: 16, 128>}, {transform_indices = @transform_1, window_bounds = array<i64: 16, 1>}, {transform_indices = @transform_2, window_bounds = array<i64: 16, 1>}]} {
    %c0 = arith.constant 0 : index
    %c0_0 = arith.constant 0 : index
    %0 = vector.load %arg1[%c0, %c0_0] : memref<16x128xf32, #tpu.memory_space<vmem>>, vector<16x128xf32>
    %c0_1 = arith.constant 0 : index
    %c0_2 = arith.constant 0 : index
    %1 = vector.load %arg2[%c0_1, %c0_2] : memref<16x1xi32, #tpu.memory_space<vmem>>, vector<16x1xi32>
    %cst = arith.constant dense<0xFF800000> : vector<16xf32>
    %2 = vector.multi_reduction <maximumf>, %0, %cst [1] : vector<16x128xf32> to vector<16xf32>
    %3 = vector.shape_cast %2 : vector<16xf32> to vector<16x1xf32>
    %4 = vector.broadcast %3 : vector<16x1xf32> to vector<16x128xf32>
    %5 = arith.subf %0, %4 : vector<16x128xf32>
    %6 = math.exp %5 : vector<16x128xf32>
    %cst_3 = arith.constant dense<0.000000e+00> : vector<16xf32>
    %7 = vector.multi_reduction <add>, %6, %cst_3 [1] : vector<16x128xf32> to vector<16xf32>
    %8 = vector.shape_cast %7 : vector<16xf32> to vector<16x1xf32>
    %9 = math.log %8 : vector<16x1xf32>
    %10 = tpu.iota {dimensions = array<i32: 1>} : vector<16x128xi32>
    %11 = vector.broadcast %1 : vector<16x1xi32> to vector<16x128xi32>
    %12 = arith.cmpi eq, %10, %11 : vector<16x128xi32>
    %13 = arith.extui %12 : vector<16x128xi1> to vector<16x128xi32>
    %14 = arith.sitofp %13 : vector<16x128xi32> to vector<16x128xf32>
    %15 = arith.mulf %5, %14 : vector<16x128xf32>
    %cst_4 = arith.constant dense<0.000000e+00> : vector<16xf32>
    %16 = vector.multi_reduction <add>, %15, %cst_4 [1] : vector<16x128xf32> to vector<16xf32>
    %17 = vector.shape_cast %16 : vector<16xf32> to vector<16x1xf32>
    %18 = arith.subf %9, %17 : vector<16x1xf32>
    %19 = tpu.iota {dimensions = array<i32: 0>} : vector<16x1xi32>
    %c16_i32 = arith.constant 16 : i32
    %20 = arith.muli %arg0, %c16_i32 : i32
    %21 = vector.broadcast %20 : i32 to vector<16x1xi32>
    %22 = arith.addi %19, %21 : vector<16x1xi32>
    %c37_i32 = arith.constant 37 : i32
    %23 = vector.broadcast %c37_i32 : i32 to vector<16x1xi32>
    %24 = arith.cmpi slt, %22, %23 : vector<16x1xi32>
    %25 = arith.extui %24 : vector<16x1xi1> to vector<16x1xi32>
    %26 = arith.sitofp %25 : vector<16x1xi32> to vector<16x1xf32>
    %27 = arith.mulf %18, %26 : vector<16x1xf32>
    %c0_5 = arith.constant 0 : index
    %c0_6 = arith.constant 0 : index
    %28 = vector.load %arg3[%c0_5, %c0_6] : memref<16x1xf32, #tpu.memory_space<vmem>>, vector<16x1xf32>
    tpu.vector_store %arg3[%c0_5, %c0_6], %27 {strides = array<i32>} : memref<16x1xf32, #tpu.memory_space<vmem>>, vector<16x1xf32>,
    return
  }
  func.func @transform_0(%arg0: i32) -> (i32, i32) {
    %c0_i32 = arith.constant 0 : i32
    %c0_i32_0 = arith.constant 0 : i32
    return %arg0, %c0_i32 : i32, i32
  }
  func.func @transform_1(%arg0: i32) -> (i32, i32) {
    %c0_i32 = arith.constant 0 : i32
    %c0_i32_0 = arith.constant 0 : i32
    return %arg0, %c0_i32 : i32, i32
  }
  func.func @transform_2(%arg0: i32) -> (i32, i32) {
    %c0_i32 = arith.constant 0 : i32
    %c0_i32_0 = arith.constant 0 : i32
    return %arg0, %c0_i32 : i32, i32
  }
}

</mosaic_0001>

<bundles_post_ra>
// kernel: tpu_custom_call.1
= control target key start
LH: loop header
LB: loop body
LE: loop exit
PB: predicated region body
PF: predicated region fallthrough
CT: control target
= control target key end

     0   :  { %s362_s9 = smov 0   ;;  %s391_s0 = inlined_call_operand.vmem [shape: f32[48,128], index: 0, kind: input, shape index: {}]   ;;  %s392_s1 = inlined_call_operand.vmem [shape: s32[48,1], index: 1, kind: input, shape index: {}]   ;;  %s393_s2 = inlined_call_operand.vmem [shape: f32[48,1], index: 2, kind: output, shape index: {}]  }
   0x1 LB: > { %s299_s10 = sadd.s32 4294967295, %s343_s9   ;;  %p303_p0 = scmp.ge.s32.totalorder %s343_s9, 1  ;;  %s343_s9 = sphi %s362_s9, %s12_s9  }
   0x2   : > { %p124_p1 = scmp.lt.s32.totalorder %s343_s9, 4 }
   0x4   : > { %p125_p2 = pnand %p303_p0, %p124_p1 }
   0x5   : > { %s304_s11 = sshll.u32 (!%p125_p2), %s299_s10, 1  ;;  %s312_s19 = sshll.u32 (!%p125_p2), %s299_s10, 4 }
   0x6   : > { %128 = sbr.rel (%p125_p2) target bundleno = 334 (0x14e), region = 28  ;;  %p152_p3 = scmp.lt.s32.totalorder (!%p125_p2), %s304_s11, 5 }
   0xb   : > { %v345_v0 = vmov 0   ;;  %s395_s11 = smov (!%p152_p3, %s304_s11), 5  ;;  %v191_v10 = vlaneseq  ;;  %v346_v16 = vmov 0.0   ;;  %v217_v23 = vstv %s312_s19 }
   0xc   : > { %327 = vset.pattern.permute.xlu1 %v345_v0  ;;  %328 = vset.pattern.permute.xlu0 %v345_v0  ;;  %s372_s12 = sshll.u32 %s395_s11, 3  ;;  %vm228_vm4 = vcmask 7168  }
   0xd   : > { %s155_s15 = scalar_lea.vmem %s391_s0, %s372_s12  ;;  %s161_s18 = scalar_lea.vmem %s392_s1, %s372_s12  ;;  %v192_v13 = vand.u32 127, %v191_v10  ;;  %v214_v22 = vshrl.u32 %v191_v10, 7 }
   0xe   : > { %v169_v1 = vld [vmem:[%s155_s15] sm:$0xff]  ;;  %v170_v3 = vld [vmem:[%s155_s15 + $0x8] sm:$0xff]  ;;  %s167_s22 = scalar_lea.vmem %s393_s2, %s372_s12 }
   0xf   : > { %173 = vmax.xlane.f32.xlu0 %v169_v1  ;;  %v171_v2 = vld [vmem:[%s161_s18] sm:$0xff]  ;;  %v172_v4 = vld [vmem:[%s161_s18 + $0x8] sm:$0xff]  ;;  %v218_v24 = vadd.s32 %v217_v23, %v214_v22  ;;  %v215_v25 = vadd.s32 8, %v214_v22 }
  0x10   : > { %194 = vperm.xlu1 %327, %v171_v2  }
  0x11   : > { %vm220_vm2 = vcmp.lt.s32.totalorder %v218_v24, 37  ;;  %v219_v27 = vadd.s32 %v217_v23, %v215_v25 }
  0x12   : > { %v313_v26 = vsel %vm220_vm2, 1.0, %v346_v16 }
  0x13   : > { %175 = vmax.xlane.f32.xlu0 %v170_v3  ;;  %vm221_vm3 = vcmp.lt.s32.totalorder %v219_v27, 37 }
  0x14   : > { %197 = vperm.xlu1 %327, %v172_v4   ;;  %v314_v28 = vsel %vm221_vm3, 1.0, %v346_v16 }
  0x8b   : > { %v195_v12 = vpop.permute.xlu1 %194 }
  0x8c   : > { %vm199_vm0 = vcmp.eq.s32.totalorder %v192_v13, %v195_v12 }
  0x8d   : > { %v310_v17 = vsel %vm199_vm0, 1.0, %v346_v16 }
  0x8f   : > { %v198_v14 = vpop.permute.xlu1 %197 }
  0x90   : > { %vm200_vm1 = vcmp.eq.s32.totalorder %v192_v13, %v198_v14 }
  0x91   : > { %v311_v20 = vsel %vm200_vm1, 1.0, %v346_v16 }
  0x98   : > { %v174_v5 = vpop.xlane.xlu0 %173 }
  0x99   : > { %v177_v6 = vsub.f32 %v169_v1, %v174_v5 }
  0x9b   : > { %v179_v7 = vmul.f32 1.442695, %v177_v6  ;;  %v205_v18 = vmul.f32 %v310_v17, %v177_v6 }
  0x9c   : > { %v176_v8 = vpop.xlane.xlu0 %175 }
  0x9d   : > { %329 = vpow2.f32 %v179_v7  ;;  %v178_v9 = vsub.f32 %v170_v3, %v176_v8 }
  0x9f   : > { %v181_v11 = vmul.f32 1.442695, %v178_v9  ;;  %v206_v21 = vmul.f32 %v311_v20, %v178_v9 }
  0xa1   : > { %331 = vpow2.f32 %v181_v11 }
  0xaa   : > { %v330_v15 = vpop.eup %329 }
  0xab   : > { %183 = vadd.xlane.f32.xlu0 %v330_v15 }
  0xae   : > { %v332_v19 = vpop.eup %331 }
  0xaf   : > { %207 = vadd.xlane.f32.xlu0 %v205_v18  ;;  %185 = vadd.xlane.f32.xlu1 %v332_v19 }
  0xb3   : > { %209 = vadd.xlane.f32.xlu0 %v206_v21 }
 0x134   : > { %v184_v29 = vpop.xlane.xlu0 %183 }
 0x135   : > { %333 = vlog2.f32 %v184_v29 }
 0x138   : > { %v186_v30 = vpop.xlane.xlu1 %185  ;;  %v208_v32 = vpop.xlane.xlu0 %207 }
 0x139   : > { %335 = vlog2.f32 %v186_v30 }
 0x13c   : > { %v210_v38 = vpop.xlane.xlu0 %209 }
 0x142   : > { %v334_v31 = vpop.eup %333 }
 0x143   : > { %v188_v33 = vmul.f32 0.6931472, %v334_v31 }
 0x145   : > { %v211_v34 = vsub.f32 %v188_v33, %v208_v32 }
 0x146   : > { %v336_v35 = vpop.eup %335 }
 0x147   : > { %v226_v36 = vmul.f32 %v313_v26, %v211_v34  ;;  %v190_v37 = vmul.f32 0.6931472, %v336_v35 }
 0x149   : > { %229 = vst.msk [vmem:[%s167_s22] sm:$0xff] %vm228_vm4, %v226_v36  ;;  %v212_v39 = vsub.f32 %v190_v37, %v210_v38 }
 0x14b   : > { %v227_v40 = vmul.f32 %v314_v28, %v212_v39 }
 0x14d   : > { %230 = vst.msk [vmem:[%s167_s22 + $0x8] sm:$0xff] %vm228_vm4, %v227_v40 }
 0x14e PF: > { %s12_s9 = sadd.s32 1, %s343_s9  }
 0x14f   : > { %p9_p4 = scmp.ge.s32.totalorder %s12_s9, 5  }
 0x151   :  { %11 = sbr.rel (!%p9_p4) target bundleno = 1 (0x1), region = 61 }

</bundles_post_ra>
